<compile_context>
chip_gen: v7x
topology: tpu7x:2x2x1
jax: 0.10.0
libtpu: 0.0.40
codegen_flags: <defaults>
</compile_context>

<pallas_src>
import jax
import jax.numpy as jnp
from jax.experimental import pallas as pl
from jax.experimental.pallas import tpu as pltpu

LANE = 128                               # TPU lane width
_VMEM_LIMIT = 32 * 1024 * 1024           # safe on v7x (64 MiB physical VMEM)
_BLOCK_BUDGET = 4 * 1024 * 1024          # per-block VMEM budget for tile picks


def _pick_rows(rows, row_bytes, cap=512):
    """Largest row tile <= cap that is a multiple of 8, divides `rows`, and
    keeps one block within the VMEM budget. Ragged/tiny row counts -> 1 block."""
    if rows < 8 or rows % 8 != 0:
        return rows
    budget_rows = max(8, (_BLOCK_BUDGET // max(row_bytes, 1)) // 8 * 8)
    t = min(cap, rows, budget_rows)
    t -= t % 8
    t = max(t, 8)
    while rows % t != 0:                 # rows % 8 == 0, so t >= 8 terminates
        t -= 8
    return t


# ---------------------------------------------------------------------------
# 1) per-channel input normalization: (x - mean) / std
# ---------------------------------------------------------------------------
def _normalize_kernel(x_ref, scale_ref, shift_ref, o_ref):
    # x_ref:(TR, HW), scale/shift:(TR, 1); fused as x * (1/std) + (-mean/std)
    o_ref[...] = x_ref[...] * scale_ref[...] + shift_ref[...]


def normalize_images(x, mean, std):
    """(x - mean) / std for NCHW images with per-channel mean/std of shape (C,)."""
    B, C, H, W = x.shape
    R, HW = B * C, H * W
    scale = jnp.tile((1.0 / std).reshape(C, 1), (B, 1))       # (R, 1)
    shift = jnp.tile((-mean / std).reshape(C, 1), (B, 1))     # (R, 1)
    xf = x.reshape(R, HW)                                     # lane axis = H*W
    TR = _pick_rows(R, HW * x.dtype.itemsize)

    out = pl.pallas_call(
        _normalize_kernel,
        out_shape=jax.ShapeDtypeStruct((R, HW), x.dtype),
        grid_spec=pltpu.PrefetchScalarGridSpec(
            num_scalar_prefetch=0,
            grid=(R // TR,),
            in_specs=[
                pl.BlockSpec((TR, HW), lambda i: (i, 0)),
                pl.BlockSpec((TR, 1), lambda i: (i, 0)),
                pl.BlockSpec((TR, 1), lambda i: (i, 0)),
            ],
            out_specs=pl.BlockSpec((TR, HW), lambda i: (i, 0)),
        ),
        compiler_params=pltpu.CompilerParams(
            dimension_semantics=("parallel",),
            vmem_limit_bytes=_VMEM_LIMIT,
        ),
        cost_estimate=pl.CostEstimate(
            flops=2 * R * HW, transcendentals=0,
            bytes_accessed=2 * R * HW * x.dtype.itemsize),
    )(xf, scale, shift)
    return out.reshape(B, C, H, W)


# ---------------------------------------------------------------------------
# 2) global average pool (AdaptiveAvgPool2d(1)) + flatten
# ---------------------------------------------------------------------------
def _avgpool_kernel(x_ref, o_ref):
    # x_ref:(TB, C, HW) -> o_ref:(TB, C): mean over the spatial (lane) axis,
    # output row is C=2048-wide -> fully lane-dense store.
    o_ref[...] = jnp.mean(x_ref[...], axis=-1)


def global_avgpool(feat):
    """avgpool + view(B, -1): (B, C, H, W) -> (B, C)."""
    B, C, H, W = feat.shape
    HW = H * W
    xf = feat.reshape(B, C, HW)
    TB = _pick_rows(B, C * HW * feat.dtype.itemsize, cap=64)

    return pl.pallas_call(
        _avgpool_kernel,
        out_shape=jax.ShapeDtypeStruct((B, C), feat.dtype),
        grid_spec=pltpu.PrefetchScalarGridSpec(
            num_scalar_prefetch=0,
            grid=(B // TB,),
            in_specs=[pl.BlockSpec((TB, C, HW), lambda i: (i, 0, 0))],
            out_specs=pl.BlockSpec((TB, C), lambda i: (i, 0)),
        ),
        compiler_params=pltpu.CompilerParams(
            dimension_semantics=("parallel",),
            vmem_limit_bytes=_VMEM_LIMIT,
        ),
        cost_estimate=pl.CostEstimate(
            flops=B * C * HW, transcendentals=0,
            bytes_accessed=(B * C * HW + B * C) * feat.dtype.itemsize),
    )(xf)


# ---------------------------------------------------------------------------
# 3) bottle_neck: nn.Linear(2048, out_dim)
# ---------------------------------------------------------------------------
def _linear_kernel(x_ref, w_ref, b_ref, o_ref):
    # x_ref: (TM, D) bf16, w_ref: (Cp, D) bf16 (PyTorch [C, D] layout, no transpose),
    # b_ref: (1, Cp) f32, o_ref: (TM, Cp) f32 lane-dense.
    acc = jax.lax.dot_general(
        x_ref[...], w_ref[...],
        dimension_numbers=(((1,), (1,)), ((), ())),   # contract D of both operands
        preferred_element_type=jnp.float32,
    )
    o_ref[...] = (acc + b_ref[...]).astype(o_ref.dtype)


def prepare_head_params(weight, bias, compute_dtype=jnp.bfloat16):
    """One-time packing of nn.Linear params (do NOT call per forward).

    weight: [C, D] (PyTorch convention), bias: [C].  Returns (w_pad [Cp, D],
    b_pad [1, Cp]) with Cp a multiple of 128 so output stores are unmasked."""
    C, D = weight.shape
    Cp = max(LANE, ((C + LANE - 1) // LANE) * LANE)
    w_pad = jnp.zeros((Cp, D), compute_dtype).at[:C, :].set(weight.astype(compute_dtype))
    b_pad = jnp.zeros((1, Cp), jnp.float32).at[0, :C].set(bias.astype(jnp.float32))
    return w_pad, b_pad


def bottle_neck_forward(x, w_pad, b_pad, out_dim, *, tm_cap=256,
                        compute_dtype=jnp.bfloat16):
    """x @ W.T + b using padded params: [B, D] f32 -> [B, out_dim] f32."""
    B, D = x.shape
    Cp = w_pad.shape[0]
    x_c = x.astype(compute_dtype)
    TM = _pick_rows(B, D * x_c.dtype.itemsize + Cp * 4, cap=tm_cap)

    bytes_accessed = (x_c.size * x_c.dtype.itemsize
                      + w_pad.size * w_pad.dtype.itemsize
                      + b_pad.size * b_pad.dtype.itemsize
                      + B * Cp * 4)

    out = pl.pallas_call(
        _linear_kernel,
        out_shape=jax.ShapeDtypeStruct((B, Cp), jnp.float32),
        grid_spec=pltpu.PrefetchScalarGridSpec(
            num_scalar_prefetch=0,
            grid=(pl.cdiv(B, TM),),
            in_specs=[
                pl.BlockSpec((TM, D), lambda i: (i, 0)),   # batch-tiled activations
                pl.BlockSpec((Cp, D), lambda i: (0, 0)),   # weight stays resident
                pl.BlockSpec((1, Cp), lambda i: (0, 0)),   # bias stays resident
            ],
            out_specs=pl.BlockSpec((TM, Cp), lambda i: (i, 0)),
        ),
        compiler_params=pltpu.CompilerParams(
            dimension_semantics=("parallel",),
            vmem_limit_bytes=_VMEM_LIMIT,
        ),
        cost_estimate=pl.CostEstimate(
            flops=2 * B * D * Cp, transcendentals=0,
            bytes_accessed=bytes_accessed),
    )(x_c, w_pad, b_pad)

    return out[:, :out_dim]             # drop the lane-padding columns


if __name__ == "__main__":
    key = jax.random.PRNGKey(0)
    k_img, k_feat, kw, kb = jax.random.split(key, 4)

    # ---- stage 1: input normalization (forward's first op) ----------------
    B, C_in, H, W = 2, 3, 32, 32
    x_img = jax.random.uniform(k_img, (B, C_in, H, W), jnp.float32)   # in [0, 1]
    mean = jnp.array([0.485, 0.456, 0.406], jnp.float32)
    std = jnp.array([0.229, 0.224, 0.225], jnp.float32)
    x_norm = normalize_images(x_img, mean, std)
    ref_norm = (x_img - mean.reshape(1, 3, 1, 1)) / std.reshape(1, 3, 1, 1)
    assert jnp.allclose(x_norm, ref_norm, atol=1e-5, rtol=1e-5)

    # TODO(synk): pretrained ResNet-50 conv backbone (conv1..layer4) runs here
    # in the real module; stub its 2048x7x7 output with random features.
    in_features, fh, fw = 2048, 7, 7
    feat = jax.random.normal(k_feat, (B, in_features, fh, fw), jnp.float32)

    # ---- stage 2: avgpool + flatten (this is what forward(x) returns) -----
    pooled = global_avgpool(feat)                       # (B, 2048)
    ref_pool = feat.mean(axis=(2, 3))
    assert pooled.shape == (B, in_features)
    assert jnp.allclose(pooled, ref_pool, atol=1e-5, rtol=1e-5)

    # ---- stage 3: bottle_neck = nn.Linear(2048, out_dim) head -------------
    out_dim = 64
    bound = 1.0 / (in_features ** 0.5)                  # nn.Linear default init
    weight = jax.random.uniform(kw, (out_dim, in_features), jnp.float32, -bound, bound)
    bias = jax.random.uniform(kb, (out_dim,), jnp.float32, -bound, bound)
    w_pad, b_pad = prepare_head_params(weight, bias)    # one-time packing
    logits = bottle_neck_forward(pooled, w_pad, b_pad, out_dim)

    jax.block_until_ready((x_norm, pooled, logits))
    assert logits.shape == (B, out_dim)

    # bf16-input / f32-accumulation reference and loose full-f32 reference.
    ref_bf16 = jnp.dot(pooled.astype(jnp.bfloat16), weight.T.astype(jnp.bfloat16),
                       preferred_element_type=jnp.float32) + bias
    assert jnp.allclose(logits, ref_bf16, atol=1e-2, rtol=1e-2)
    ref_f32 = pooled @ weight.T + bias
    assert jnp.allclose(logits, ref_f32, atol=5e-2, rtol=5e-2)

    print("KERNEL_OK")
</pallas_src>

<mosaic_0001>
module attributes {stable_mosaic.version = 11 : i64} {
  func.func @_normalize_kernel(%arg0: i32, %arg1: memref<6x1024xf32, #tpu.memory_space<vmem>>, %arg2: memref<6x1xf32, #tpu.memory_space<vmem>>, %arg3: memref<6x1xf32, #tpu.memory_space<vmem>>, %arg4: memref<6x1024xf32, #tpu.memory_space<vmem>>) attributes {dimension_semantics = [#tpu.dimension_semantics<parallel>], iteration_bounds = array<i64: 1>, scalar_prefetch = 0 : i64, scratch_operands = 0 : i64, tpu.core_type = #tpu.core_type<tc>, window_params = [{transform_indices = @transform_0, window_bounds = array<i64: 6, 1024>}, {transform_indices = @transform_1, window_bounds = array<i64: 6, 1>}, {transform_indices = @transform_2, window_bounds = array<i64: 6, 1>}, {transform_indices = @transform_3, window_bounds = array<i64: 6, 1024>}]} {
    %c0 = arith.constant 0 : index
    %c0_0 = arith.constant 0 : index
    %0 = vector.load %arg1[%c0, %c0_0] : memref<6x1024xf32, #tpu.memory_space<vmem>>, vector<6x1024xf32>
    %c0_1 = arith.constant 0 : index
    %c0_2 = arith.constant 0 : index
    %1 = vector.load %arg2[%c0_1, %c0_2] : memref<6x1xf32, #tpu.memory_space<vmem>>, vector<6x1xf32>
    %2 = vector.broadcast %1 : vector<6x1xf32> to vector<6x1024xf32>
    %3 = arith.mulf %0, %2 : vector<6x1024xf32>
    %c0_3 = arith.constant 0 : index
    %c0_4 = arith.constant 0 : index
    %4 = vector.load %arg3[%c0_3, %c0_4] : memref<6x1xf32, #tpu.memory_space<vmem>>, vector<6x1xf32>
    %5 = vector.broadcast %4 : vector<6x1xf32> to vector<6x1024xf32>
    %6 = arith.addf %3, %5 : vector<6x1024xf32>
    %c0_5 = arith.constant 0 : index
    %c0_6 = arith.constant 0 : index
    %7 = vector.load %arg4[%c0_5, %c0_6] : memref<6x1024xf32, #tpu.memory_space<vmem>>, vector<6x1024xf32>
    tpu.vector_store %arg4[%c0_5, %c0_6], %6 {strides = array<i32>} : memref<6x1024xf32, #tpu.memory_space<vmem>>, vector<6x1024xf32>,
    return
  }
  func.func @transform_0(%arg0: i32) -> (i32, i32) {
    %c0_i32 = arith.constant 0 : i32
    %c0_i32_0 = arith.constant 0 : i32
    return %arg0, %c0_i32 : i32, i32
  }
  func.func @transform_1(%arg0: i32) -> (i32, i32) {
    %c0_i32 = arith.constant 0 : i32
    %c0_i32_0 = arith.constant 0 : i32
    return %arg0, %c0_i32 : i32, i32
  }
  func.func @transform_2(%arg0: i32) -> (i32, i32) {
    %c0_i32 = arith.constant 0 : i32
    %c0_i32_0 = arith.constant 0 : i32
    return %arg0, %c0_i32 : i32, i32
  }
  func.func @transform_3(%arg0: i32) -> (i32, i32) {
    %c0_i32 = arith.constant 0 : i32
    %c0_i32_0 = arith.constant 0 : i32
    return %arg0, %c0_i32 : i32, i32
  }
}

</mosaic_0001>

<bundles_post_ra>
// kernel: tpu_custom_call.1
= control target key start
LH: loop header
LB: loop body
LE: loop exit
PB: predicated region body
PF: predicated region fallthrough
CT: control target
= control target key end

     0   :  { %8 = vsyncpa [#allocation3], 0  ;;  %s191_s0 = inlined_call_operand.hbm [shape: f32[6,1024], index: 0, kind: input, shape index: {}]   ;;  %s192_s1 = inlined_call_operand.vmem [shape: f32[6,1], index: 1, kind: input, shape index: {}]   ;;  %s193_s2 = inlined_call_operand.vmem [shape: f32[6,1], index: 2, kind: input, shape index: {}]   ;;  %s194_s3 = inlined_call_operand.hbm [shape: f32[6,1024], index: 3, kind: output, shape index: {}]  }
   0x1   :  { %9 = vsyncpa [#allocation4], 0  ;;  %s138_s12 = smov [#allocation2]   ;;  %s90_s16 = scalar_lea.hbm %s191_s0, 1024 }
   0x2   :  { %s16_s13 = sshll.u32 %s138_s12, 4  ;;  %p91_p0 = scmp.ne.s32.totalorder %s191_s0, %s90_s16  ;;  %s17_s13 = int_to_ptr.vmem [resolvable:$true] %s16_s13 }
   0x3   :  { %p94_p1 = scmp.lt.u32.totalorder %s90_s16, %s191_s0 }
   0x5   :  { %p96_p2 = pnand %p94_p1, %p91_p0 }
   0x7   :  { %99 = shalt.err (!%p96_p2)
}
   0x8   :  { %s100_s21 = scalar_lea.vmem %s17_s13, 1024  ;;  %p105_p4 = scmp.lt.s32.totalorder %s17_s13, %s17_s13 }
   0x9   :  { %p101_p3 = scmp.ne.s32.totalorder %s17_s13, %s100_s21  ;;  %p106_p5 = scmp.lt.s32.totalorder %s100_s21, %s100_s21 }
   0xb   :  { %p107_p6 = por %p106_p5, %p105_p4 }
   0xd   :  { %p108_p7 = pnand %p107_p6, %p101_p3 }
   0xf   :  { %111 = shalt.err (!%p108_p7)
}
  0x10   :  { %19 = dma.hbm_to_vmem [thread:$0]  %s191_s0, 1024, %s17_s13, [#allocation3]  }
  0x11   :  { %134 = dma.done.wait [#allocation3], 1024  }
  0x12   :  { %135 = vsyncadd [#allocation3], 4294966272  ;;  %v139_v0 = vmov 0   ;;  %v35_v1 = vld [vmem:[%s192_s1] sm:$0x3f]  ;;  %s140_s0 = smov [#allocation5]  }
  0x13   :  { %89 = vset.pattern.permute.xlu0 %v139_v0  ;;  %v49_v2 = vld [vmem:[%s193_s2] sm:$0x3f]  ;;  %v28_v4 = vld [vmem:[#allocation2 + $0x8] sm:$0x3f]  ;;  %v29_v5 = vld [vmem:[#allocation2 + $0x10] sm:$0x3f] }
  0x14   :  { %38 = vperm.xlu0 %89, %v35_v1   ;;  %v27_v3 = vld [vmem:[#allocation2] sm:$0x3f]  ;;  %v30_v7 = vld [vmem:[#allocation2 + $0x18] sm:$0x3f]  ;;  %v32_v9 = vld [vmem:[#allocation2 + $0x28] sm:$0x3f] }
  0x15   :  { %v31_v8 = vld [vmem:[#allocation2 + $0x20] sm:$0x3f]  ;;  %v33_v10 = vld [vmem:[#allocation2 + $0x30] sm:$0x3f]  ;;  %v34_v11 = vld [vmem:[#allocation2 + $0x38] sm:$0x3f] }
  0x16   :  { %s77_s1 = sshll.u32 %s140_s0, 4  ;;  %s78_s1 = int_to_ptr.vmem [resolvable:$true] %s77_s1 }
  0x17   :  { %s112_s2 = scalar_lea.vmem %s78_s1, 1024  ;;  %p117_p9 = scmp.lt.s32.totalorder %s78_s1, %s78_s1 }
  0x18   :  { %52 = vperm.xlu0 %89, %v49_v2   ;;  %p113_p8 = scmp.ne.s32.totalorder %s78_s1, %s112_s2  ;;  %p118_p10 = scmp.lt.s32.totalorder %s112_s2, %s112_s2 }
  0x1a   :  { %p119_p11 = por %p118_p10, %p117_p9 }
  0x1c   :  { %p120_p12 = pnand %p119_p11, %p113_p8 }
  0x93   :  { %v39_v6 = vpop.permute.xlu0 %38 }
  0x94   :  { %v41_v12 = vmul.f32 %v39_v6, %v27_v3  ;;  %v42_v13 = vmul.f32 %v39_v6, %v28_v4  ;;  %v43_v14 = vmul.f32 %v39_v6, %v29_v5  ;;  %v44_v15 = vmul.f32 %v39_v6, %v30_v7 }
  0x95   :  { %v45_v17 = vmul.f32 %v39_v6, %v31_v8  ;;  %v46_v18 = vmul.f32 %v39_v6, %v32_v9  ;;  %v47_v19 = vmul.f32 %v39_v6, %v33_v10  ;;  %v48_v20 = vmul.f32 %v39_v6, %v34_v11 }
  0x97   :  { %v53_v16 = vpop.permute.xlu0 %52 }
  0x98   :  { %v55_v21 = vadd.f32 %v53_v16, %v41_v12  ;;  %v56_v22 = vadd.f32 %v53_v16, %v42_v13  ;;  %v57_v23 = vadd.f32 %v53_v16, %v43_v14  ;;  %v58_v24 = vadd.f32 %v53_v16, %v44_v15 }
  0x99   :  { %v59_v25 = vadd.f32 %v53_v16, %v45_v17  ;;  %v60_v26 = vadd.f32 %v53_v16, %v46_v18  ;;  %v61_v27 = vadd.f32 %v53_v16, %v47_v19  ;;  %v62_v28 = vadd.f32 %v53_v16, %v48_v20 }
  0x9a   :  { %63 = vst [vmem:[#allocation5] sm:$0x3f] %v55_v21  ;;  %64 = vst [vmem:[#allocation5 + $0x8] sm:$0x3f] %v56_v22 }
  0x9b   :  { %65 = vst [vmem:[#allocation5 + $0x10] sm:$0x3f] %v57_v23  ;;  %66 = vst [vmem:[#allocation5 + $0x18] sm:$0x3f] %v58_v24 }
  0x9c   :  { %67 = vst [vmem:[#allocation5 + $0x20] sm:$0x3f] %v59_v25  ;;  %68 = vst [vmem:[#allocation5 + $0x28] sm:$0x3f] %v60_v26 }
  0x9d   :  { %69 = vst [vmem:[#allocation5 + $0x30] sm:$0x3f] %v61_v27  ;;  %70 = vst [vmem:[#allocation5 + $0x38] sm:$0x3f] %v62_v28 }
  0x9e   :  { %123 = shalt.err (!%p120_p12)
}
  0x9f   :  { %s124_s30 = scalar_lea.hbm %s194_s3, 1024 }
  0xa0   :  { %p125_p13 = scmp.ne.s32.totalorder %s194_s3, %s124_s30  ;;  %p128_p0 = scmp.lt.u32.totalorder %s124_s30, %s194_s3 }
  0xa2   :  { %p130_p1 = pnand %p128_p0, %p125_p13 }
  0xa4   :  { %133 = shalt.err (!%p130_p1)
}
  0xa5   :  { %80 = dma.vmem_to_hbm [thread:$0]  %s78_s1, 1024, %s194_s3, [#allocation4]  }
  0xa6   :  { %136 = dma.done.wait [#allocation4], 1024  }
  0xa7   :  { %137 = vsyncadd [#allocation4], 4294966272 }
  0xa8   :  { %84 = vsyncpa [#allocation3], 1 }
  0xa9   :  { %85 = vsyncpa [#allocation4], 1 }

</bundles_post_ra>
